<compile_context>
chip_gen: v6e
topology: v6e:2x2x1
jax: 0.10.0
libtpu: 0.0.40
codegen_flags: <defaults>
</compile_context>

<pallas_src>
import jax
import jax.numpy as jnp
import numpy as np
from jax.experimental import pallas as pl
from jax.experimental.pallas import tpu as pltpu

_LANE = 128
_SUBLANE_PACK = {1: 32, 2: 16, 4: 8}  # itemsize (bytes) -> sublane multiple


# ----------------------------------------------------------------------------
# Kernels
# ----------------------------------------------------------------------------
def _identity_alias_kernel(x_ref, o_ref):
    # Zero-copy pass-through: input buffer is aliased onto the output
    # (input_output_aliases={0: 0}), both refs live in pl.ANY (HBM), and the
    # body issues no DMAs -> the kernel itself moves no bytes.
    del x_ref, o_ref


def _copy_kernel(x_ref, o_ref):
    # Bit-identical block copy (only used on the optional materializing path).
    o_ref[...] = x_ref[...]


# ----------------------------------------------------------------------------
# Helpers
# ----------------------------------------------------------------------------
def _resolve_target_shape(batch, in_shape, target):
    """torch.Tensor.view-style target-shape resolution (supports one -1)."""
    rest = int(np.prod(in_shape[1:])) if len(in_shape) > 1 else 1
    target = tuple(int(t) for t in target)
    if target.count(-1) > 1:
        raise ValueError("Reshape: only one dimension may be -1")
    if -1 in target:
        known = 1
        for t in target:
            if t != -1:
                known *= t
        if known <= 0 or rest % known != 0:
            raise ValueError(f"Reshape: cannot infer -1 in {target} for input {in_shape}")
        target = tuple(rest // known if t == -1 else t for t in target)
    if int(np.prod(target)) != rest:
        raise ValueError(f"Reshape: {target} incompatible with input {in_shape}")
    return (batch,) + target


def _tpu_generation_params():
    """(block_bytes, vmem_limit_bytes) tuned per TPU generation."""
    try:
        kind = jax.devices()[0].device_kind.lower()
    except Exception:
        kind = ""
    if "7" in kind:
        # v7x: 64 MiB physical VMEM -> 4 MiB blocks (16 MiB peak double-buffered
        # in+out), keep the scoped limit at 48 MiB with headroom.
        return 4 * 1024 * 1024, 48 * 1024 * 1024
    # v5e / v6e: 128 MiB physical VMEM -> 8 MiB blocks, raise the scoped limit
    # past v5e's 16 MiB default.
    return 8 * 1024 * 1024, 64 * 1024 * 1024


# ----------------------------------------------------------------------------
# Pallas paths
# ----------------------------------------------------------------------------
def _zero_copy_passthrough(x):
    """pallas_call boundary with no HBM traffic: ANY memspace + io alias + empty body."""
    return pl.pallas_call(
        _identity_alias_kernel,
        out_shape=jax.ShapeDtypeStruct(x.shape, x.dtype),
        in_specs=[pl.BlockSpec(memory_space=pl.ANY)],
        out_specs=pl.BlockSpec(memory_space=pl.ANY),
        input_output_aliases={0: 0},
    )(x)


def _tiled_copy(x):
    """Optional materializing copy: lane-dense blocks, byte-sized per dtype/gen."""
    total = int(x.size)
    dtype = x.dtype
    itemsize = jnp.dtype(dtype).itemsize
    block_bytes, vmem_limit = _tpu_generation_params()
    cost = pl.CostEstimate(flops=0, transcendentals=0,
                           bytes_accessed=2 * total * itemsize)  # read + write

    if total % _LANE == 0:
        # Lane-dense layout (rows, 128): every store is an unmasked full-width vst.
        rows = total // _LANE
        x2d = x.reshape(rows, _LANE)                       # free metadata reshape
        sub = _SUBLANE_PACK.get(itemsize, 8)
        max_rows = max(sub, (block_bytes // (_LANE * itemsize)) // sub * sub)
        block_rows = rows if rows <= max_rows else max_rows
        grid = (pl.cdiv(rows, block_rows),)                # ragged tail masked by Pallas
        out2d = pl.pallas_call(
            _copy_kernel,
            out_shape=jax.ShapeDtypeStruct((rows, _LANE), dtype),
            grid=grid,
            in_specs=[pl.BlockSpec((block_rows, _LANE), lambda i: (i, 0))],
            out_specs=pl.BlockSpec((block_rows, _LANE), lambda i: (i, 0)),
            compiler_params=pltpu.CompilerParams(
                dimension_semantics=("parallel",),   # shard blocks across TCs where available
                vmem_limit_bytes=vmem_limit,
            ),
            cost_estimate=cost,
        )(x2d)
        return out2d.reshape(-1)

    # Payload not a multiple of 128 lanes: copy it as a single full-array block
    # (block == full array dims, exempt from the (8,128) rule) — no wrapper pad.
    # TODO(synk): tile huge non-128-multiple payloads with a masked tail block.
    flat = x.reshape(total)
    out = pl.pallas_call(
        _copy_kernel,
        out_shape=jax.ShapeDtypeStruct((total,), dtype),
        in_specs=[pl.BlockSpec((total,), lambda: (0,))],
        out_specs=pl.BlockSpec((total,), lambda: (0,)),
        compiler_params=pltpu.CompilerParams(vmem_limit_bytes=vmem_limit),
        cost_estimate=cost,
    )(flat)
    return out


# ----------------------------------------------------------------------------
# Public wrapper == Reshape(*shape).forward(x)
# ----------------------------------------------------------------------------
def pallas_reshape(x, *shape, force_copy_kernel=False):
    """Pallas equivalent of Reshape(*shape).forward(x): x.view((x.shape[0],) + shape)."""
    out_shape = _resolve_target_shape(x.shape[0], x.shape, shape)
    if force_copy_kernel:
        return _tiled_copy(x).reshape(out_shape)
    y = _zero_copy_passthrough(x)        # zero-HBM-traffic pallas_call boundary
    return jnp.reshape(y, out_shape)     # metadata-only


if __name__ == "__main__":
    key = jax.random.PRNGKey(0)
    x = jax.random.normal(key, (2, 4, 16, 16), jnp.float32)  # N=2, C=4, H=W=16

    # References computed up front (before any aliasing pallas_call touches x).
    ref1 = np.asarray(jnp.reshape(x, (2, 16, 64)))
    ref2 = np.asarray(jnp.reshape(x, (2, 1024)))

    # Reshape(16, 64): (2, 4, 16, 16) -> (2, 16, 64) via the zero-copy path.
    out1 = jax.block_until_ready(pallas_reshape(x, 16, 64))
    np.testing.assert_array_equal(np.asarray(out1), ref1)

    # Reshape(-1): exercises the torch.view-style -1 inference.
    out2 = jax.block_until_ready(pallas_reshape(x, -1))
    np.testing.assert_array_equal(np.asarray(out2), ref2)

    # Optional materializing copy kernel (lane-dense tiled path).
    out3 = jax.block_until_ready(pallas_reshape(x, 16, 64, force_copy_kernel=True))
    np.testing.assert_array_equal(np.asarray(out3), ref1)

    print("KERNEL_OK")
</pallas_src>

<mosaic_0001>
module attributes {stable_mosaic.version = 11 : i64} {
  func.func @_identity_alias_kernel(%arg0: memref<2x4x16x16xf32, #tpu.memory_space<any>>, %arg1: memref<2x4x16x16xf32, #tpu.memory_space<any>>) attributes {dimension_semantics = [], scalar_prefetch = 0 : i64, scratch_operands = 0 : i64, tpu.core_type = #tpu.core_type<tc>} {
    return
  }
}

</mosaic_0001>

<bundles_post_ra>
// kernel: tpu_custom_call.1
= control target key start
LH: loop header
LB: loop body
LE: loop exit
PB: predicated region body
PF: predicated region fallthrough
CT: control target
= control target key end

     0   :  { %s16_s0 = inlined_call_operand.hbm [shape: f32[2,4,16,16], index: 0, kind: input, shape index: {}, may-alias: {0,1}]   ;;  %s17_s1 = inlined_call_operand.hbm [shape: f32[2,4,16,16], index: 1, kind: output, shape index: {}, may-alias: {0,1}]  }

</bundles_post_ra>
